<compile_context>
chip_gen: v5e
topology: v5e:2x2
jax: 0.10.0
libtpu: 0.0.40
codegen_flags: <defaults>
</compile_context>

<pallas_src>
import math

import jax
import jax.numpy as jnp
from jax.experimental import pallas as pl
from jax.experimental.pallas import tpu as pltpu


def _vmem_capacity_bytes():
    """Physical per-core VMEM; conservative fallback = v7x (64 MiB)."""
    try:
        cap = getattr(pltpu.get_tpu_info(), "vmem_capacity_bytes", None)
        if cap:
            return int(cap)
    except Exception:
        pass
    return 64 * 1024 * 1024


def _live_bytes(tm, K, itemsize, single_buffer_weight=True):
    """Per-grid-step live-VMEM estimate.

    Counts Pallas's double buffers on the x1/x3/out tiles, the x2 weight block
    (single- or double-buffered) plus its bf16 scratch copy, and the f32/bf16
    intermediates the kernel body materializes (s, e, acc, bf16 x1/e copies).
    """
    io = tm * K
    dbuf = 2 * 3 * io * itemsize                       # x1 + x3 + out, double-buffered
    wbuf = (1 if single_buffer_weight else 2) * K * K * itemsize + 2 * K * K
    inter = 16 * io                                    # ~3 f32 + 2 bf16 (tm, K) temporaries
    return dbuf + wbuf + inter


def _choose_m_tile(B, M, K, itemsize, budget):
    """Largest sublane-aligned M tile whose per-step live bytes fit the budget,
    while keeping >= 2 grid steps unless the whole problem is tiny."""
    cands = [t for t in (1024, 512, 256, 128, 64, 32, 16, 8) if M % t == 0]
    if not cands or cands[0] != M:
        cands = [M] + cands                            # full-M block is always legal
    tiny = (2 * B * M * K + B * K * K) * itemsize <= (1 << 20)
    for tm in cands:
        if _live_bytes(tm, K, itemsize) > budget:
            continue
        if B * (M // tm) >= 2 or tiny or tm == cands[-1]:
            return tm
    # Nothing fits the budget: take the smallest aligned tile anyway.
    # TODO(synk): flash-style online softmax over (K, tn) column blocks of x2
    # for K large enough that the (K, K) weight tile alone busts VMEM (v7x 64 MiB).
    return cands[-1]


def _sfdp_body(x1_ref, x2_bf16, x3_ref, o_ref):
    """One (tm, K) row slab against the resident (K, K) bf16 weight."""
    inv_scale = 1.0 / math.sqrt(x2_bf16.shape[-1])
    x1 = x1_ref[...].astype(jnp.bfloat16)                         # (tm, K)

    # scores = x1 @ x2 / sqrt(K) + x3   (bf16 MXU operands, f32 accumulate)
    s = jnp.dot(x1, x2_bf16, preferred_element_type=jnp.float32)  # (tm, K)
    s = s * inv_scale + x3_ref[...]

    # Numerically stable softmax; normalization deferred past the 2nd matmul
    # (row-scale factors out of the matmul), so no explicit `p` intermediate.
    m = jnp.max(s, axis=-1, keepdims=True)
    e = jnp.exp(s - m)                                            # (tm, K) f32
    denom = jnp.sum(e, axis=-1, keepdims=True)                    # (tm, 1)

    acc = jnp.dot(e.astype(jnp.bfloat16), x2_bf16,
                  preferred_element_type=jnp.float32)             # (tm, K)
    # EUP vrcp (approx) keeps the VALU slots free.
    o_ref[...] = (acc * pl.reciprocal(denom, approx=True)).astype(o_ref.dtype)


def _make_kernel(hoist_weight_cast):
    if hoist_weight_cast:
        def kernel(x1_ref, x2_ref, x3_ref, o_ref, x2b_ref):
            # Cast the resident (K, K) weight to bf16 once per batch element;
            # the m grid axis is 'arbitrary' and x2's block index is constant
            # across it, so the scratch stays valid for all m tiles.
            @pl.when(pl.program_id(1) == 0)
            def _():
                x2b_ref[...] = x2_ref[...].astype(jnp.bfloat16)
            _sfdp_body(x1_ref, x2b_ref[...], x3_ref, o_ref)
        return kernel

    def kernel(x1_ref, x2_ref, x3_ref, o_ref):
        # B == 1: keep the m axis 'parallel' (v7x TC sharding) -> cast per step.
        _sfdp_body(x1_ref, x2_ref[...].astype(jnp.bfloat16), x3_ref, o_ref)
    return kernel


def _build_sfdp_call(B, M, K, tm, dtype, itemsize, vmem_limit, single_buffer_weight):
    hoist = B >= 2   # >=2 parallel batch steps exist -> m can be 'arbitrary'
    grid = (B, M // tm)

    x2_kwargs = {"pipeline_mode": pl.Buffered(1)} if single_buffer_weight else {}
    in_specs = [
        pl.BlockSpec((None, tm, K), lambda b, m: (b, m, 0)),
        # Weight block: index is constant across m -> resident, not re-DMA'd.
        pl.BlockSpec((None, K, K), lambda b, m: (b, 0, 0), **x2_kwargs),
        pl.BlockSpec((None, tm, K), lambda b, m: (b, m, 0)),
    ]
    out_specs = pl.BlockSpec((None, tm, K), lambda b, m: (b, m, 0))
    scratch = [pltpu.VMEM((K, K), jnp.bfloat16)] if hoist else []

    cost = pl.CostEstimate(
        flops=4 * B * M * K * K,                       # two (M,K)x(K,K) matmuls
        transcendentals=B * M * K,                     # exp
        bytes_accessed=itemsize * (3 * B * M * K + B * K * K),
    )

    return pl.pallas_call(
        _make_kernel(hoist),
        out_shape=jax.ShapeDtypeStruct((B, M, K), dtype),
        grid_spec=pltpu.PrefetchScalarGridSpec(
            num_scalar_prefetch=0,
            grid=grid,
            in_specs=in_specs,
            out_specs=out_specs,
            scratch_shapes=scratch,
        ),
        compiler_params=pltpu.CompilerParams(
            dimension_semantics=("parallel", "arbitrary" if hoist else "parallel"),
            vmem_limit_bytes=vmem_limit,
        ),
        cost_estimate=cost,
    )


def sfdp_model(x1, x2, x3, *, block_budget_bytes=None):
    """x1: (B, M, K), x2: (B, K, K), x3: (B, M, K) -> (B, M, K)."""
    B, M, K = x1.shape
    assert x2.shape == (B, K, K), x2.shape
    assert x3.shape == (B, M, K), x3.shape
    itemsize = x1.dtype.itemsize

    vmem_cap = _vmem_capacity_bytes()
    if block_budget_bytes is None:
        # ~21 MiB/step on 128 MiB-VMEM parts (v5e/v6e), ~10 MiB on v7x (64 MiB).
        block_budget_bytes = vmem_cap // 6

    tm = _choose_m_tile(B, M, K, itemsize, block_budget_bytes)
    live = _live_bytes(tm, K, itemsize)
    # Raise the scoped-VMEM limit to cover the estimate (v5e default is 16 MiB)
    # while staying well under v7x's 64 MiB physical VMEM.
    vmem_limit = int(min(0.75 * vmem_cap, max(24 * 1024 * 1024, 1.5 * live)))

    # Prefer a single-buffered x2 block (its block index never changes across
    # the m axis); fall back to the default double-buffered spec if this JAX
    # build rejects pl.Buffered(1).
    try:
        fn = _build_sfdp_call(B, M, K, tm, x1.dtype, itemsize, vmem_limit, True)
        return fn(x1, x2, x3)
    except Exception:
        fn = _build_sfdp_call(B, M, K, tm, x1.dtype, itemsize, vmem_limit, False)
        return fn(x1, x2, x3)


def sfdp_ref(x1, x2, x3):
    v1 = jnp.einsum("bmk,bkn->bmn", x1, x2)
    v2 = v1 / math.sqrt(v1.shape[-1])
    v3 = v2 + x3
    v4 = jax.nn.softmax(v3, axis=-1)
    return jnp.einsum("bmn,bnk->bmk", v4, x2)


if __name__ == "__main__":
    key = jax.random.PRNGKey(0)
    k1, k2, k3, j1, j2, j3, l1, l2, l3 = jax.random.split(key, 9)

    # bf16 MXU operands + EUP approximate reciprocal vs. a pure-f32 reference:
    # bf16-level tolerance (drop the bf16 casts / approx=True for tight parity).
    ATOL = RTOL = 5e-2

    # 1) Small shapes consistent with the module's (batch, seq, hidden) pattern.
    B, M, K = 2, 32, 128
    x1 = jax.random.normal(k1, (B, M, K), dtype=jnp.float32)
    x2 = jax.random.normal(k2, (B, K, K), dtype=jnp.float32)
    x3 = jax.random.uniform(k3, (B, M, K), dtype=jnp.float32)
    out = jax.block_until_ready(sfdp_model(x1, x2, x3))
    ref = jax.block_until_ready(sfdp_ref(x1, x2, x3))
    assert out.shape == (B, M, K)
    assert jnp.allclose(out, ref, atol=ATOL, rtol=RTOL), (
        f"mismatch (small path): max|err|={float(jnp.max(jnp.abs(out - ref)))}")

    # 2) M-tiled path (grid = batch x M-tiles, (K, K) weight resident + bf16
    #    cast hoisted once per batch element) via a small per-step budget.
    B2, M2, K2 = 2, 256, 128
    y1 = jax.random.normal(j1, (B2, M2, K2), dtype=jnp.float32)
    y2 = jax.random.normal(j2, (B2, K2, K2), dtype=jnp.float32)
    y3 = jax.random.uniform(j3, (B2, M2, K2), dtype=jnp.float32)
    out2 = jax.block_until_ready(
        sfdp_model(y1, y2, y3, block_budget_bytes=384 * 1024))
    ref2 = jax.block_until_ready(sfdp_ref(y1, y2, y3))
    assert jnp.allclose(out2, ref2, atol=ATOL, rtol=RTOL), "mismatch (tiled path)"

    # 3) B == 1 variant (original module's batch size): per-step weight cast,
    #    m axis kept 'parallel'.
    B3, M3, K3 = 1, 32, 128
    z1 = jax.random.normal(l1, (B3, M3, K3), dtype=jnp.float32)
    z2 = jax.random.normal(l2, (B3, K3, K3), dtype=jnp.float32)
    z3 = jax.random.uniform(l3, (B3, M3, K3), dtype=jnp.float32)
    out3 = jax.block_until_ready(sfdp_model(z1, z2, z3))
    ref3 = jax.block_until_ready(sfdp_ref(z1, z2, z3))
    assert jnp.allclose(out3, ref3, atol=ATOL, rtol=RTOL), "mismatch (B=1 path)"

    print("KERNEL_OK")
</pallas_src>

<mosaic_0001>
module attributes {stable_mosaic.version = 11 : i64} {
  func.func @kernel(%arg0: i32, %arg1: i32, %arg2: memref<1x32x128xf32, #tpu.memory_space<vmem>>, %arg3: memref<1x128x128xf32, #tpu.memory_space<vmem>>, %arg4: memref<1x32x128xf32, #tpu.memory_space<vmem>>, %arg5: memref<1x32x128xf32, #tpu.memory_space<vmem>>, %arg6: memref<128x128xbf16, #tpu.memory_space<vmem>>) attributes {dimension_semantics = [#tpu.dimension_semantics<parallel>, #tpu.dimension_semantics<arbitrary>], iteration_bounds = array<i64: 2, 1>, scalar_prefetch = 0 : i64, scratch_operands = 1 : i64, tpu.core_type = #tpu.core_type<tc>, window_params = [{transform_indices = @transform_0, window_bounds = array<i64: 1, 32, 128>}, {pipeline_mode = #tpu.pipeline_mode<synchronous>, transform_indices = @transform_1, window_bounds = array<i64: 1, 128, 128>}, {transform_indices = @transform_2, window_bounds = array<i64: 1, 32, 128>}, {transform_indices = @transform_3, window_bounds = array<i64: 1, 32, 128>}]} {
    %c0_i32 = arith.constant 0 : i32
    %0 = arith.cmpi eq, %arg1, %c0_i32 : i32
    %1 = arith.extui %0 : i1 to i32
    %c0_i32_0 = arith.constant 0 : i32
    %2 = arith.cmpi ne, %1, %c0_i32_0 : i32
    scf.if %2 {
      %c0_15 = arith.constant 0 : index
      %c0_16 = arith.constant 0 : index
      %c0_17 = arith.constant 0 : index
      %28 = vector.load %arg3[%c0_15, %c0_16, %c0_17] : memref<1x128x128xf32, #tpu.memory_space<vmem>>, vector<1x128x128xf32>
      %29 = vector.shape_cast %28 : vector<1x128x128xf32> to vector<128x128xf32>
      %30 = arith.truncf %29 : vector<128x128xf32> to vector<128x128xbf16>
      %c0_18 = arith.constant 0 : index
      %c0_19 = arith.constant 0 : index
      %31 = vector.load %arg6[%c0_18, %c0_19] : memref<128x128xbf16, #tpu.memory_space<vmem>>, vector<128x128xbf16>
      tpu.vector_store %arg6[%c0_18, %c0_19], %30 {strides = array<i32>} : memref<128x128xbf16, #tpu.memory_space<vmem>>, vector<128x128xbf16>,
    } else {
    }
    %c0 = arith.constant 0 : index
    %c0_1 = arith.constant 0 : index
    %3 = vector.load %arg6[%c0, %c0_1] : memref<128x128xbf16, #tpu.memory_space<vmem>>, vector<128x128xbf16>
    %c0_2 = arith.constant 0 : index
    %c0_3 = arith.constant 0 : index
    %c0_4 = arith.constant 0 : index
    %4 = vector.load %arg2[%c0_2, %c0_3, %c0_4] : memref<1x32x128xf32, #tpu.memory_space<vmem>>, vector<1x32x128xf32>
    %5 = vector.shape_cast %4 : vector<1x32x128xf32> to vector<32x128xf32>
    %6 = arith.truncf %5 : vector<32x128xf32> to vector<32x128xbf16>
    %cst = arith.constant dense<0.000000e+00> : vector<32x128xf32>
    %7 = tpu.matmul %6, %3, %cst {dimension_numbers = #tpu.dot_dimension_numbers<[1], [0], [0], [1], [0, 0, 1, 1], [], []>} : vector<32x128xbf16>, vector<128x128xbf16>, vector<32x128xf32> -> vector<32x128xf32>
    %cst_5 = arith.constant 0.0883883461 : f32
    %8 = vector.broadcast %cst_5 : f32 to vector<32x128xf32>
    %9 = arith.mulf %7, %8 : vector<32x128xf32>
    %c0_6 = arith.constant 0 : index
    %c0_7 = arith.constant 0 : index
    %c0_8 = arith.constant 0 : index
    %10 = vector.load %arg4[%c0_6, %c0_7, %c0_8] : memref<1x32x128xf32, #tpu.memory_space<vmem>>, vector<1x32x128xf32>
    %11 = vector.shape_cast %10 : vector<1x32x128xf32> to vector<32x128xf32>
    %12 = arith.addf %9, %11 : vector<32x128xf32>
    %cst_9 = arith.constant dense<0xFF800000> : vector<32xf32>
    %13 = vector.multi_reduction <maximumf>, %12, %cst_9 [1] : vector<32x128xf32> to vector<32xf32>
    %14 = vector.shape_cast %13 : vector<32xf32> to vector<32x1xf32>
    %15 = vector.broadcast %14 : vector<32x1xf32> to vector<32x128xf32>
    %16 = arith.subf %12, %15 : vector<32x128xf32>
    %17 = math.exp %16 : vector<32x128xf32>
    %cst_10 = arith.constant dense<0.000000e+00> : vector<32xf32>
    %18 = vector.multi_reduction <add>, %17, %cst_10 [1] : vector<32x128xf32> to vector<32xf32>
    %19 = vector.shape_cast %18 : vector<32xf32> to vector<32x1xf32>
    %20 = arith.truncf %17 : vector<32x128xf32> to vector<32x128xbf16>
    %cst_11 = arith.constant dense<0.000000e+00> : vector<32x128xf32>
    %21 = tpu.matmul %20, %3, %cst_11 {dimension_numbers = #tpu.dot_dimension_numbers<[1], [0], [0], [1], [0, 0, 1, 1], [], []>} : vector<32x128xbf16>, vector<128x128xbf16>, vector<32x128xf32> -> vector<32x128xf32>
    %22 = tpu.reciprocal %19 {approx = true} : vector<32x1xf32> -> vector<32x1xf32>
    %23 = vector.broadcast %22 : vector<32x1xf32> to vector<32x128xf32>
    %24 = arith.mulf %21, %23 : vector<32x128xf32>
    %c0_12 = arith.constant 0 : index
    %c0_13 = arith.constant 0 : index
    %c0_14 = arith.constant 0 : index
    %25 = vector.load %arg5[%c0_12, %c0_13, %c0_14] : memref<1x32x128xf32, #tpu.memory_space<vmem>>, vector<1x32x128xf32>
    %26 = vector.shape_cast %25 : vector<1x32x128xf32> to vector<32x128xf32>
    %27 = vector.shape_cast %24 : vector<32x128xf32> to vector<1x32x128xf32>
    tpu.vector_store %arg5[%c0_12, %c0_13, %c0_14], %27 {strides = array<i32>} : memref<1x32x128xf32, #tpu.memory_space<vmem>>, vector<1x32x128xf32>,
    return
  }
  func.func @transform_0(%arg0: i32, %arg1: i32) -> (i32, i32, i32) {
    %c0_i32 = arith.constant 0 : i32
    %c0_i32_0 = arith.constant 0 : i32
    return %arg0, %arg1, %c0_i32 : i32, i32, i32
  }
  func.func @transform_1(%arg0: i32, %arg1: i32) -> (i32, i32, i32) {
    %c0_i32 = arith.constant 0 : i32
    %c0_i32_0 = arith.constant 0 : i32
    %c0_i32_1 = arith.constant 0 : i32
    return %arg0, %c0_i32, %c0_i32_0 : i32, i32, i32
  }
  func.func @transform_2(%arg0: i32, %arg1: i32) -> (i32, i32, i32) {
    %c0_i32 = arith.constant 0 : i32
    %c0_i32_0 = arith.constant 0 : i32
    return %arg0, %arg1, %c0_i32 : i32, i32, i32
  }
  func.func @transform_3(%arg0: i32, %arg1: i32) -> (i32, i32, i32) {
    %c0_i32 = arith.constant 0 : i32
    %c0_i32_0 = arith.constant 0 : i32
    return %arg0, %arg1, %c0_i32 : i32, i32, i32
  }
}

module attributes {stable_mosaic.version = 11 : i64} {
  func.func @kernel(%arg0: i32, %arg1: i32, %arg2: memref<1x32x128xf32, #tpu.memory_space<vmem>>, %arg3: memref<1x128x128xf32, #tpu.memory_space<vmem>>, %arg4: memref<1x32x128xf32, #tpu.memory_space<vmem>>, %arg5: memref<1x32x128xf32, #tpu.memory_space<vmem>>, %arg6: memref<128x128xbf16, #tpu.memory_space<vmem>>) attributes {dimension_semantics = [#tpu.dimension_semantics<parallel>, #tpu.dimension_semantics<arbitrary>], iteration_bounds = array<i64: 2, 1>, scalar_prefetch = 0 : i64, scratch_operands = 1 : i64, tpu.core_type = #tpu.core_type<tc>, window_params = [{transform_indices = @transform_0, window_bounds = array<i64: 1, 32, 128>}, {transform_indices = @transform_1, window_bounds = array<i64: 1, 128, 128>}, {transform_indices = @transform_2, window_bounds = array<i64: 1, 32, 128>}, {transform_indices = @transform_3, window_bounds = array<i64: 1, 32, 128>}]} {
    %c0_i32 = arith.constant 0 : i32
    %0 = arith.cmpi eq, %arg1, %c0_i32 : i32
    %1 = arith.extui %0 : i1 to i32
    %c0_i32_0 = arith.constant 0 : i32
    %2 = arith.cmpi ne, %1, %c0_i32_0 : i32
    scf.if %2 {
      %c0_15 = arith.constant 0 : index
      %c0_16 = arith.constant 0 : index
      %c0_17 = arith.constant 0 : index
      %28 = vector.load %arg3[%c0_15, %c0_16, %c0_17] : memref<1x128x128xf32, #tpu.memory_space<vmem>>, vector<1x128x128xf32>
      %29 = vector.shape_cast %28 : vector<1x128x128xf32> to vector<128x128xf32>
      %30 = arith.truncf %29 : vector<128x128xf32> to vector<128x128xbf16>
      %c0_18 = arith.constant 0 : index
      %c0_19 = arith.constant 0 : index
      %31 = vector.load %arg6[%c0_18, %c0_19] : memref<128x128xbf16, #tpu.memory_space<vmem>>, vector<128x128xbf16>
      tpu.vector_store %arg6[%c0_18, %c0_19], %30 {strides = array<i32>} : memref<128x128xbf16, #tpu.memory_space<vmem>>, vector<128x128xbf16>,
    } else {
    }
    %c0 = arith.constant 0 : index
    %c0_1 = arith.constant 0 : index
    %3 = vector.load %arg6[%c0, %c0_1] : memref<128x128xbf16, #tpu.memory_space<vmem>>, vector<128x128xbf16>
    %c0_2 = arith.constant 0 : index
    %c0_3 = arith.constant 0 : index
    %c0_4 = arith.constant 0 : index
    %4 = vector.load %arg2[%c0_2, %c0_3, %c0_4] : memref<1x32x128xf32, #tpu.memory_space<vmem>>, vector<1x32x128xf32>
    %5 = vector.shape_cast %4 : vector<1x32x128xf32> to vector<32x128xf32>
    %6 = arith.truncf %5 : vector<32x128xf32> to vector<32x128xbf16>
    %cst = arith.constant dense<0.000000e+00> : vector<32x128xf32>
    %7 = tpu.matmul %6, %3, %cst {dimension_numbers = #tpu.dot_dimension_numbers<[1], [0], [0], [1], [0, 0, 1, 1], [], []>} : vector<32x128xbf16>, vector<128x128xbf16>, vector<32x128xf32> -> vector<32x128xf32>
    %cst_5 = arith.constant 0.0883883461 : f32
    %8 = vector.broadcast %cst_5 : f32 to vector<32x128xf32>
    %9 = arith.mulf %7, %8 : vector<32x128xf32>
    %c0_6 = arith.constant 0 : index
    %c0_7 = arith.constant 0 : index
    %c0_8 = arith.constant 0 : index
    %10 = vector.load %arg4[%c0_6, %c0_7, %c0_8] : memref<1x32x128xf32, #tpu.memory_space<vmem>>, vector<1x32x128xf32>
    %11 = vector.shape_cast %10 : vector<1x32x128xf32> to vector<32x128xf32>
    %12 = arith.addf %9, %11 : vector<32x128xf32>
    %cst_9 = arith.constant dense<0xFF800000> : vector<32xf32>
    %13 = vector.multi_reduction <maximumf>, %12, %cst_9 [1] : vector<32x128xf32> to vector<32xf32>
    %14 = vector.shape_cast %13 : vector<32xf32> to vector<32x1xf32>
    %15 = vector.broadcast %14 : vector<32x1xf32> to vector<32x128xf32>
    %16 = arith.subf %12, %15 : vector<32x128xf32>
    %17 = math.exp %16 : vector<32x128xf32>
    %cst_10 = arith.constant dense<0.000000e+00> : vector<32xf32>
    %18 = vector.multi_reduction <add>, %17, %cst_10 [1] : vector<32x128xf32> to vector<32xf32>
    %19 = vector.shape_cast %18 : vector<32xf32> to vector<32x1xf32>
    %20 = arith.truncf %17 : vector<32x128xf32> to vector<32x128xbf16>
    %cst_11 = arith.constant dense<0.000000e+00> : vector<32x128xf32>
    %21 = tpu.matmul %20, %3, %cst_11 {dimension_numbers = #tpu.dot_dimension_numbers<[1], [0], [0], [1], [0, 0, 1, 1], [], []>} : vector<32x128xbf16>, vector<128x128xbf16>, vector<32x128xf32> -> vector<32x128xf32>
    %22 = tpu.reciprocal %19 {approx = true} : vector<32x1xf32> -> vector<32x1xf32>
    %23 = vector.broadcast %22 : vector<32x1xf32> to vector<32x128xf32>
    %24 = arith.mulf %21, %23 : vector<32x128xf32>
    %c0_12 = arith.constant 0 : index
    %c0_13 = arith.constant 0 : index
    %c0_14 = arith.constant 0 : index
    %25 = vector.load %arg5[%c0_12, %c0_13, %c0_14] : memref<1x32x128xf32, #tpu.memory_space<vmem>>, vector<1x32x128xf32>
    %26 = vector.shape_cast %25 : vector<1x32x128xf32> to vector<32x128xf32>
    %27 = vector.shape_cast %24 : vector<32x128xf32> to vector<1x32x128xf32>
    tpu.vector_store %arg5[%c0_12, %c0_13, %c0_14], %27 {strides = array<i32>} : memref<1x32x128xf32, #tpu.memory_space<vmem>>, vector<1x32x128xf32>,
    return
  }
  func.func @transform_0(%arg0: i32, %arg1: i32) -> (i32, i32, i32) {
    %c0_i32 = arith.constant 0 : i32
    %c0_i32_0 = arith.constant 0 : i32
    return %arg0, %arg1, %c0_i32 : i32, i32, i32
  }
  func.func @transform_1(%arg0: i32, %arg1: i32) -> (i32, i32, i32) {
    %c0_i32 = arith.constant 0 : i32
    %c0_i32_0 = arith.constant 0 : i32
    %c0_i32_1 = arith.constant 0 : i32
    return %arg0, %c0_i32, %c0_i32_0 : i32, i32, i32
  }
  func.func @transform_2(%arg0: i32, %arg1: i32) -> (i32, i32, i32) {
    %c0_i32 = arith.constant 0 : i32
    %c0_i32_0 = arith.constant 0 : i32
    return %arg0, %arg1, %c0_i32 : i32, i32, i32
  }
  func.func @transform_3(%arg0: i32, %arg1: i32) -> (i32, i32, i32) {
    %c0_i32 = arith.constant 0 : i32
    %c0_i32_0 = arith.constant 0 : i32
    return %arg0, %arg1, %c0_i32 : i32, i32, i32
  }
}

</mosaic_0001>

<bundles_post_ra>
// kernel: tpu_custom_call.1
= control target key start
LH: loop header
LB: loop body
LE: loop exit
PB: predicated region body
PF: predicated region fallthrough
CT: control target
= control target key end

     0   :  { %s1274_s0 = inlined_call_operand.hbm [shape: f32[2,32,128], index: 0, kind: input, shape index: {}]   ;;  %s1275_s1 = inlined_call_operand.hbm [shape: f32[2,128,128], index: 1, kind: input, shape index: {}]   ;;  %s1276_s2 = inlined_call_operand.hbm [shape: f32[2,32,128], index: 2, kind: input, shape index: {}]   ;;  %s1277_s3 = inlined_call_operand.hbm [shape: f32[2,32,128], index: 3, kind: output, shape index: {}]  }
   0x1   :  { %1278 = sst [smem:[#allocation14_spill]] %s1274_s0 }
   0x2   :  { %1279 = sst [smem:[#allocation15_spill]] %s1276_s2 }
   0x3   :  { %8 = vsyncpa [#allocation4], 0 }
   0x4   :  { %10 = vsyncpa [#allocation4 + $0x1], 0 }
   0x5   :  { %11 = vsyncpa [#allocation7], 0 }
   0x6   :  { %12 = vsyncpa [#allocation5], 0 }
   0x7   :  { %14 = vsyncpa [#allocation5 + $0x1], 0  ;;  %s1063_s12 = smov 0   ;;  %s1065_s13 = smov 0  }
   0x8   :  { %s1067_s14 = smov 0   ;;  %s1069_s15 = smov 0  }
   0x9   :  { %s1071_s16 = smov 0   ;;  %s1073_s17 = smov 0  }
   0xa LB: > { %s32_s18 = sadd.s32 1, %s1032_s16  ;;  %s41_s19 = sadd.s32 1, %s1024_s14  ;;  %s1036_s17 = sphi %s1073_s17, %s20_s17   ;;  %s1032_s16 = sphi %s1071_s16, %s1294_s16   ;;  %s1028_s15 = sphi %s1069_s15, %s1293_s15   ;;  %s1024_s14 = sphi %s1067_s14, %s1292_s14   ;;  %s1020_s13 = sphi %s1065_s13, %s1291_s13   ;;  %s1016_s12 = sphi %s1063_s12, %s1290_s12  }
   0xb   : > { %p34_p0 = scmp.ge.s32.totalorder %s32_s18, 2  ;;  %p48_p1 = scmp.ne.s32.totalorder %s1024_s14, %s1020_s13 }
   0xc   : > { %p49_p2 = scmp.eq.s32.totalorder %s1036_s17, 0  ;;  %p785_p6 = scmp.lt.s32.totalorder %s1036_s17, 2 }
   0xd   : > { %s1296_s18 = smov (%p34_p0, %s32_s18), 0  ;;  %s177_s22 = sand.u32 1, %s1036_s17  }
   0xe   : > { %p1103_p3 = por %p49_p2, %p48_p1  ;;  %s36_s21 = ssub.s32 %s1032_s16, %s1296_s18 }
   0xf   : > { %p39_p5 = scmp.eq.s32.totalorder %s36_s21, 0  ;;  %s179_s23 = sand.u32 1, %s1024_s14  }
  0x10   : > { %s640_s25 = sshll.u32 %s179_s23, 5  ;;  %s688_s26 = sshll.u32 %s1032_s16, 5 }
  0x11   : > { %s1114_s24 = scalar_select %p39_p5, %s1024_s14, %s41_s19  }
  0x12   : > { %s1281_s0 = sld [smem:[#allocation14_spill]]  ;;  %s181_s30 = scalar_lea.vmem [#allocation3], %s640_s25 }
  0x13   : > { %s191_s4 = sshll.u32 %s181_s30, 4  ;;  %p1122_p7 = pnand %p785_p6, %p1103_p3  ;;  %s192_s4 = int_to_ptr.vmem [resolvable:$true] %s191_s4 }
  0x14   : > { %s1283_s2 = sld [smem:[#allocation15_spill]]  ;;  %s1129_s11 = scalar_lea.sflag [#allocation4], %s177_s22 }
  0x15   : > { %s1038_s19 = smov 128   ;;  %s1039_s21 = smov 8  }
  0x16   : > { %s205_s20 = scalar_lea.vmem [#allocation8], %s640_s25  ;;  %s635_s22 = sadd.s32 4294967294, %s1036_s17  }
  0x17   : > { %s215_s23 = sshll.u32 %s205_s20, 4  ;;  %p54_p8 = scmp.ne.s32.totalorder %s1020_s13, %s1016_s12  ;;  %s216_s23 = int_to_ptr.vmem [resolvable:$true] %s215_s23 }
  0x18   : > { %s188_s29 = scalar_lea.hbm %s1281_s0, %s688_s26  ;;  %p140_p11 = scmp.eq.s32.totalorder %s635_s22, 1 }
  0x19   : > { %s189_s5 = sshll.u32 %s188_s29, 4  ;;  %p636_p12 = scmp.ge.s32.totalorder %s1036_s17, 1  ;;  %s190_s5 = int_to_ptr.hbm [resolvable:$true] %s189_s5 }
  0x1a   : > { %s212_s9 = scalar_lea.hbm %s1283_s2, %s688_s26  ;;  %s1140_s26 = sadd.s32 4294967295, %s1036_s17  }
  0x1b   : > { %s213_s10 = sshll.u32 %s212_s9, 4  ;;  %p55_p9 = scmp.eq.s32.totalorder %s1140_s26, 0  ;;  %s1137_s10 = int_to_ptr.hbm [resolvable:$true] %s213_s10 }
  0x1c   : > { %777 = dma.hbm_to_vmem [thread:$0]  (!%p1122_p7), %s190_s5, 512, %s192_s4, %s1129_s11, %s1038_s19, %s1038_s19, %s1039_s21  }
  0x1d   : > { %p134_p10 = scmp.eq.s32.totalorder %s1140_s26, 1  ;;  %p1148_p13 = por %p55_p9, %p54_p8 }
  0x1e   : > { %p1159_p2 = por %p140_p11, %p54_p8  ;;  %p147_p3 = scmp.lt.s32.totalorder %s1036_s17, 3 }
  0x1f   : > { %p1155_p0 = por %p134_p10, %p48_p1  ;;  %s687_s29 = sshll.u32 %s1028_s15, 7 }
  0x20   : > { %p1165_p5 = pnand %p636_p12, %p147_p3  ;;  %s160_s7 = scalar_lea.hbm %s1275_s1, %s687_s29 }
  0x21   : > { %s161_s8 = sshll.u32 %s160_s7, 4  ;;  %s1040_s9 = smov [#allocation6]   ;;  %s162_s8 = int_to_ptr.hbm [resolvable:$true] %s161_s8 }
  0x22   : > { %s163_s20 = sshll.u32 %s1040_s9, 4  ;;  %p770_p1 = pneg %p1165_p5  ;;  %s164_s20 = int_to_ptr.vmem [resolvable:$true] %s163_s20 }
  0x23   : > { %780 = dma.hbm_to_vmem [thread:$0]  (!%p1122_p7), %s1137_s10, 512, %s216_s23, %s1129_s11, %s1038_s19, %s1038_s19, %s1039_s21  }
  0x24   : > { %p1176_p6 = pnand %p770_p1, %p1148_p13  ;;  %s916_s29 = sshra.s32 %s162_s8, 4  ;;  %s917_s29 = int_to_ptr.hbm [resolvable:$true] %s916_s29 }
  0x25   : > { %s918_s4 = scalar_lea.hbm %s917_s29, 128  ;;  %s923_s9 = scalar_lea.hbm %s1275_s1, 256 }
  0x26   : > { %p919_p8 = scmp.ne.s32.totalorder %s917_s29, %s918_s4  ;;  %p920_p9 = pneg %p1176_p6 }
  0x27   : > { %p924_p12 = scmp.lt.s32.totalorder %s917_s29, %s1275_s1  ;;  %p925_p3 = scmp.lt.s32.totalorder %s923_s9, %s918_s4 }
  0x28   : > { %p921_p10 = pnand %p920_p9, %p919_p8 }
  0x29   : > { %p926_p1 = por %p925_p3, %p924_p12 }
  0x2a   : > { %p922_p11 = pneg %p921_p10 }
  0x2c   : > { %p927_p4 = pnand %p926_p1, %p922_p11 }
  0x2e   : > { %930 = shalt.err (!%p927_p4)
}
  0x2f   : > { %773 = dma.hbm_to_vmem [thread:$0]  (!%p1176_p6), %s162_s8, 2048, %s164_s20, [#allocation7], %s1038_s19, %s1038_s19, %s1039_s21  }
  0x30   : > { %227 = sbr.rel (%p1165_p5) target bundleno = 519 (0x207), region = 32  ;;  %s229_s6 = sand.u32 (!%p1165_p5), 1, %s1140_s26  }
  0x31   : > { %s231_s0 = sand.u32 (!%p1165_p5), 1, %s1020_s13   ;;  %s230_s10 = scalar_lea.sflag (!%p1165_p5), [#allocation4], %s229_s6 }
  0x32   : > { %s1206_s2 = sshll.u32 (!%p1165_p5), %s231_s0, 5 }
  0x33   : > { %s1209_s11 = scalar_lea.vmem (!%p1165_p5), [#allocation3], %s1206_s2 }
  0x35   : > { %999 = dma.done.wait (%p1148_p13), %s230_s10, 512  }
  0x36   : > { %1001 = vsyncadd (%p1148_p13), %s230_s10, 4294966784 }
  0x37   : > { %1003 = dma.done.wait (%p1148_p13), [#allocation7], 2048  }
  0x38   : > { %1005 = vsyncadd (%p1148_p13), [#allocation7], 4294965248  ;;  %s1220_s19 = scalar_lea.vmem [#allocation8], %s1206_s2 }
  0x39   : > { %1007 = dma.done.wait (%p1148_p13), %s230_s10, 512  }
  0x3a   : > { %1009 = vsyncadd (%p1148_p13), %s230_s10, 4294966784  ;;  %v298_v0 = vld [vmem:[#allocation6 + $0x70] sm:$0xff]  ;;  %v299_v1 = vld [vmem:[#allocation6 + $0x78] sm:$0xff]  ;;  %s276_s21 = scalar_lea.vmem [#allocation9], %s1206_s2  ;;  %s698_s23 = sshll.u32 %s1028_s15, 5 }
  0x3b   : > { %v296_v2 = vld [vmem:[#allocation6 + $0x60] sm:$0xff]  ;;  %v737_v3 = vpack.c.bf16 %v299_v1, %v298_v0  ;;  %v297_v4 = vld [vmem:[#allocation6 + $0x68] sm:$0xff]  ;;  %v294_v5 = vld [vmem:[#allocation6 + $0x50] sm:$0xff]  ;;  %s508_s30 = scalar_lea.hbm %s1277_s3, %s698_s23  ;;  %s509_s8 = sshll.u32 %s276_s21, 4  ;;  %s510_s8 = int_to_ptr.vmem [resolvable:$true] %s509_s8 }
  0x3c   : > { %v295_v6 = vld [vmem:[#allocation6 + $0x58] sm:$0xff]  ;;  %v732_v7 = vpack.c.bf16 %v297_v4, %v296_v2  ;;  %v292_v9 = vld [vmem:[#allocation6 + $0x40] sm:$0xff]  ;;  %v293_v10 = vld [vmem:[#allocation6 + $0x48] sm:$0xff]  ;;  %s511_s20 = sshll.u32 %s508_s30, 4  ;;  %s495_s15 = scalar_lea.sflag [#allocation5], %s231_s0  ;;  %s512_s20 = int_to_ptr.hbm [resolvable:$true] %s511_s20 }
  0x3d   : > { %v727_v8 = vpack.c.bf16 %v295_v6, %v294_v5  ;;  %v290_v11 = vld [vmem:[#allocation6 + $0x30] sm:$0xff]  ;;  %745 = vst [vmem:[#allocation2 + $0x38] sm:$0xff] %v737_v3   ;;  %v722_v12 = vpack.c.bf16 %v293_v10, %v292_v9  ;;  %v291_v13 = vld [vmem:[#allocation6 + $0x38] sm:$0xff]  ;;  %v288_v14 = vld [vmem:[#allocation6 + $0x20] sm:$0xff]  ;;  %s960_s22 = sshra.s32 %s512_s20, 4  ;;  %s966_s7 = scalar_lea.hbm %s1277_s3, 64  ;;  %s961_s22 = int_to_ptr.hbm [resolvable:$true] %s960_s22 }
  0x3e   : > { %v289_v15 = vld [vmem:[#allocation6 + $0x28] sm:$0xff]  ;;  %744 = vst [vmem:[#allocation2 + $0x28] sm:$0xff] %v732_v7   ;;  %v717_v16 = vpack.c.bf16 %v291_v13, %v290_v11  ;;  %v286_v18 = vld [vmem:[#allocation6 + $0x10] sm:$0xff]  ;;  %v287_v19 = vld [vmem:[#allocation6 + $0x18] sm:$0xff]  ;;  %s962_s29 = scalar_lea.hbm %s961_s22, 32  ;;  %p967_p5 = scmp.lt.s32.totalorder %s961_s22, %s1277_s3 }
  0x3f   : > { %v712_v17 = vpack.c.bf16 %v289_v15, %v288_v14  ;;  %v284_v20 = vld [vmem:[#allocation6] sm:$0xff]  ;;  %743 = vst [vmem:[#allocation2 + $0x20] sm:$0xff] %v727_v8   ;;  %v707_v21 = vpack.c.bf16 %v287_v19, %v286_v18  ;;  %v285_v22 = vld [vmem:[#allocation6 + $0x8] sm:$0xff]  ;;  %v350_v34 = vld [vmem:[%s1209_s11 + $0x10] sm:$0xff]  ;;  %p963_p4 = scmp.ne.s32.totalorder %s961_s22, %s962_s29  ;;  %p968_p6 = scmp.lt.s32.totalorder %s966_s7, %s962_s29 }
  0x40   : > { %742 = vst [vmem:[#allocation2 + $0x8] sm:$0xff] %v722_v12   ;;  %v702_v23 = vpack.c.bf16 %v285_v22, %v284_v20  ;;  %v348_v31 = vld [vmem:[%s1209_s11] sm:$0xff]  ;;  %v349_v32 = vld [vmem:[%s1209_s11 + $0x8] sm:$0xff]  ;;  %v351_v35 = vld [vmem:[%s1209_s11 + $0x18] sm:$0xff] }
  0x41   : > { %741 = vst [vmem:[#allocation2 + $0x10] sm:$0xff] %v717_v16   ;;  %v352_v36 = vpack.c.bf16 %v349_v32, %v348_v31  ;;  %v353_v37 = vpack.c.bf16 %v351_v35, %v350_v34  ;;  %v425_v39 = vld [vmem:[%s1220_s19] sm:$0xff]  ;;  %v427_v43 = vld [vmem:[%s1220_s19 + $0x10] sm:$0xff]  ;;  %v426_v46 = vld [vmem:[%s1220_s19 + $0x8] sm:$0xff]  ;;  %p964_p7 = pnand %p963_p4, %p1155_p0  ;;  %p969_p8 = por %p968_p6, %p967_p5 }
  0x42   : > { %740 = vst [vmem:[#allocation2 + $0x18] sm:$0xff] %v712_v17   ;;  %v428_v51 = vld [vmem:[%s1220_s19 + $0x18] sm:$0xff] }
  0x43   : > { %739 = vst [vmem:[#allocation2] sm:$0xff] %v707_v21   ;;  %p965_p13 = pneg %p964_p7 }
  0x44   : > { %v697_v24 = vld [vmem:[#allocation2 + $0x38] sm:$0xff]  ;;  %703 = vst [vmem:[#allocation2 + $0x30] sm:$0xff] %v702_v23  }
  0x45   : > { %402 = vmatpush.bf16.msra.mxu0 %v697_v24  ;;  %746 = vmatpush.bf16.msra.mxu2 %v697_v24  ;;  %v696_v25 = vld [vmem:[#allocation2 + $0x28] sm:$0xff]  ;;  %p970_p9 = pnand %p969_p8, %p965_p13 }
  0x46   : > { %463 = vmatpush.bf16.msra.mxu1 %v697_v24  ;;  %754 = vmatpush.bf16.msra.mxu3 %v697_v24  ;;  %v695_v26 = vld [vmem:[#allocation2 + $0x20] sm:$0xff] }
  0x47   : > { %v694_v27 = vld [vmem:[#allocation2 + $0x8] sm:$0xff] }
  0x48   : > { %v693_v28 = vld [vmem:[#allocation2 + $0x10] sm:$0xff] }
  0x49   : > { %403 = vmatpush.bf16.msra.mxu0 %v696_v25  ;;  %747 = vmatpush.bf16.msra.mxu2 %v696_v25  ;;  %v692_v29 = vld [vmem:[#allocation2 + $0x18] sm:$0xff] }
  0x4a   : > { %464 = vmatpush.bf16.msra.mxu1 %v696_v25  ;;  %755 = vmatpush.bf16.msra.mxu3 %v696_v25  ;;  %v691_v30 = vld [vmem:[#allocation2] sm:$0xff] }
  0x4b   : > { %v690_v33 = vld [vmem:[#allocation2 + $0x30] sm:$0xff] }
  0x4d   : > { %404 = vmatpush.bf16.msra.mxu0 %v695_v26  ;;  %748 = vmatpush.bf16.msra.mxu2 %v695_v26 }
  0x4e   : > { %465 = vmatpush.bf16.msra.mxu1 %v695_v26  ;;  %756 = vmatpush.bf16.msra.mxu3 %v695_v26 }
  0x51   : > { %405 = vmatpush.bf16.msra.mxu0 %v694_v27  ;;  %749 = vmatpush.bf16.msra.mxu2 %v694_v27 }
  0x52   : > { %466 = vmatpush.bf16.msra.mxu1 %v694_v27  ;;  %757 = vmatpush.bf16.msra.mxu3 %v694_v27 }
  0x55   : > { %406 = vmatpush.bf16.msra.mxu0 %v693_v28  ;;  %750 = vmatpush.bf16.msra.mxu2 %v693_v28 }
  0x56   : > { %467 = vmatpush.bf16.msra.mxu1 %v693_v28  ;;  %758 = vmatpush.bf16.msra.mxu3 %v693_v28 }
  0x59   : > { %407 = vmatpush.bf16.msra.mxu0 %v692_v29  ;;  %751 = vmatpush.bf16.msra.mxu2 %v692_v29 }
  0x5a   : > { %468 = vmatpush.bf16.msra.mxu1 %v692_v29  ;;  %759 = vmatpush.bf16.msra.mxu3 %v692_v29 }
  0x5d   : > { %408 = vmatpush.bf16.msra.mxu0 %v691_v30  ;;  %752 = vmatpush.bf16.msra.mxu2 %v691_v30 }
  0x5e   : > { %469 = vmatpush.bf16.msra.mxu1 %v691_v30  ;;  %760 = vmatpush.bf16.msra.mxu3 %v691_v30 }
  0x61   : > { %409 = vmatpush.bf16.msra.mxu0 %v690_v33  ;;  %753 = vmatpush.bf16.msra.mxu2 %v690_v33 }
  0x62   : > { %470 = vmatpush.bf16.msra.mxu1 %v690_v33  ;;  %761 = vmatpush.bf16.msra.mxu3 %v690_v33 }
  0x64   : > { %410 = vmatmul.bf16.vlgmr.msra.gmra.mxu0 %v352_v36  ;;  %415 = vmatmul.bf16.vlgmr.msra.gmra.mxu2 %v353_v37 }
  0xe1   : > { %v411_v38 = vpop.f32.mrf.mxu0 }
  0xe2   : > { %v421_v40 = vmul.f32 0.088388346, %v411_v38 }
  0xe4   : > { %v429_v41 = vadd.f32 %v425_v39, %v421_v40 }
  0xe6   : > { %433 = vmax.xlane.f32.xlu1 %v429_v41 }
  0xe7   : > { %v416_v42 = vpop.f32.mrf.mxu2 }
  0xe8   : > { %v423_v44 = vmul.f32 0.088388346, %v416_v42 }
  0xe9   : > { %v413_v45 = vpop.f32.mrf.mxu0 }
  0xea   : > { %v422_v47 = vmul.f32 0.088388346, %v413_v45  ;;  %v431_v48 = vadd.f32 %v427_v43, %v423_v44 }
  0xec   : > { %437 = vmax.xlane.f32.xlu0 %v431_v48  ;;  %v430_v49 = vadd.f32 %v426_v46, %v422_v47 }
  0xee   : > { %435 = vmax.xlane.f32.xlu1 %v430_v49 }
  0xef   : > { %v418_v50 = vpop.f32.mrf.mxu2 }
  0xf0   : > { %v424_v52 = vmul.f32 0.088388346, %v418_v50 }
  0xf2   : > { %v432_v53 = vadd.f32 %v428_v51, %v424_v52 }
  0xf4   : > { %439 = vmax.xlane.f32.xlu0 %v432_v53 }
 0x159   : > { %v434_v54 = vpop.xlane.xlu1 %433 }
 0x15a   : > { %v441_v55 = vsub.f32 %v429_v41, %v434_v54 }
 0x15c   : > { %v445_v56 = vmul.f32 1.442695, %v441_v55 }
 0x15e   : > { %840 = vpow2.f32 %v445_v56 }
 0x15f   : > { %v438_v57 = vpop.xlane.xlu0 %437 }
 0x160   : > { %v443_v58 = vsub.f32 %v431_v48, %v438_v57 }
 0x161   : > { %v436_v59 = vpop.xlane.xlu1 %435 }
 0x162   : > { %v449_v60 = vmul.f32 1.442695, %v443_v58  ;;  %v442_v61 = vsub.f32 %v430_v49, %v436_v59 }
 0x164   : > { %v841_v62 = vpop.eup %840  ;;  %842 = vpow2.f32 %v449_v60  ;;  %v447_v63 = vmul.f32 1.442695, %v442_v61 }
 0x165   : > { %453 = vadd.xlane.f32.xlu2 %v841_v62 }
 0x166   : > { %844 = vpow2.f32 %v447_v63 }
 0x167   : > { %v440_v0 = vpop.xlane.xlu0 %439 }
 0x168   : > { %v444_v1 = vsub.f32 %v432_v53, %v440_v0 }
 0x16a   : > { %v843_v2 = vpop.eup %842  ;;  %v451_v3 = vmul.f32 1.442695, %v444_v1 }
 0x16b   : > { %457 = vadd.xlane.f32.xlu0 %v843_v2 }
 0x16c   : > { %v845_v4 = vpop.eup %844  ;;  %846 = vpow2.f32 %v451_v3 }
 0x16d   : > { %455 = vadd.xlane.f32.xlu2 %v845_v4  ;;  %v461_v5 = vpack.c.bf16 %v845_v4, %v841_v62 }
 0x16f   : > { %471 = vmatmul.bf16.vlgmr.msra.gmra.mxu1 %v461_v5 }
 0x172   : > { %v847_v6 = vpop.eup %846 }
 0x173   : > { %459 = vadd.xlane.f32.xlu1 %v847_v6  ;;  %v462_v7 = vpack.c.bf16 %v847_v6, %v843_v2 }
 0x175   : > { %476 = vmatmul.bf16.vlgmr.msra.gmra.mxu3 %v462_v7 }
 0x1d8   : > { %v454_v8 = vpop.xlane.xlu2 %453 }
 0x1d9   : > { %848 = vrcp.f32 %v454_v8 }
 0x1de   : > { %v458_v13 = vpop.xlane.xlu0 %457 }
 0x1df   : > { %v849_v10 = vpop.eup %848 }
 0x1e0   : > { %v456_v9 = vpop.xlane.xlu2 %455 }
 0x1e1   : > { %850 = vrcp.f32 %v456_v9 }
 0x1e2   : > { %852 = vrcp.f32 %v458_v13 }
 0x1e6   : > { %v460_v17 = vpop.xlane.xlu1 %459 }
 0x1e7   : > { %v851_v14 = vpop.eup %850  ;;  %854 = vrcp.f32 %v460_v17 }
 0x1e8   : > { %v853_v18 = vpop.eup %852 }
 0x1ec   : > { %v472_v11 = vpop.f32.mrf.mxu1 }
 0x1ed   : > { %v486_v12 = vmul.f32 %v849_v10, %v472_v11  ;;  %v855_v21 = vpop.eup %854 }
 0x1ef   : > { %490 = vst [vmem:[%s276_s21] sm:$0xff] %v486_v12 }
 0x1f4   : > { %v474_v15 = vpop.f32.mrf.mxu1 }
 0x1f5   : > { %v487_v16 = vmul.f32 %v851_v14, %v474_v15 }
 0x1f7   : > { %491 = vst [vmem:[%s276_s21 + $0x8] sm:$0xff] %v487_v16 }
 0x1f8   : > { %v477_v19 = vpop.f32.mrf.mxu3 }
 0x1f9   : > { %v488_v20 = vmul.f32 %v853_v18, %v477_v19 }
 0x1fb   : > { %492 = vst [vmem:[%s276_s21 + $0x10] sm:$0xff] %v488_v20 }
 0x200   : > { %v479_v22 = vpop.f32.mrf.mxu3 }
 0x201   : > { %v489_v23 = vmul.f32 %v855_v21, %v479_v22 }
 0x203   : > { %493 = vst [vmem:[%s276_s21 + $0x18] sm:$0xff] %v489_v23 }
 0x204   : > { %973 = shalt.err (!%p970_p9)
}
 0x205   : > { %s1041_s0 = smov 128   ;;  %s1042_s2 = smov 8  }
 0x206   : > { %768 = dma.vmem_to_hbm [thread:$0]  (%p1155_p0), %s510_s8, 512, %s512_s20, %s495_s15, %s1041_s0, %s1041_s0, %s1042_s2  }
 0x207 PF: > { %s526_s10 = sand.u32 1, %s1016_s12   ;;  %p1289_p10 = scmp.ge.s32.totalorder %s1036_s17, 2 }
 0x208   : > { %s527_s11 = scalar_lea.sflag [#allocation5], %s526_s10 }
 0x209   : > { %p782_p11 = pnand %p1289_p10, %p1159_p2 }
 0x20b   : > { %p783_p12 = pneg %p782_p11 }
 0x20d   : > { %1011 = dma.done.wait (%p783_p12), %s527_s11, 512  }
 0x20e   : > { %1013 = vsyncadd (%p783_p12), %s527_s11, 4294966784  ;;  %s20_s17 = sadd.s32 1, %s1036_s17   ;;  %s1290_s12 = smov %s1020_s13 }
 0x20f   : > { %p17_p3 = scmp.ge.s32.totalorder %s20_s17, 4   ;;  %s1291_s13 = smov %s1024_s14 }
 0x210   : > { %s1292_s14 = smov %s1114_s24  ;;  %s1293_s15 = smov %s1032_s16 }
 0x211   : > { %s1294_s16 = smov %s1296_s18  ;;  %19 = sbr.rel (!%p17_p3) target bundleno = 10 (0xa), region = 97 }
 0x216   :  { %533 = vsyncpa [#allocation4], 1 }
 0x217   :  { %535 = vsyncpa [#allocation4 + $0x1], 1 }
 0x218   :  { %536 = vsyncpa [#allocation7], 1 }
 0x219   :  { %537 = vsyncpa [#allocation5], 1 }
 0x21a   :  { %539 = vsyncpa [#allocation5 + $0x1], 1 }

// kernel: tpu_custom_call.1
= control target key start
LH: loop header
LB: loop body
LE: loop exit
PB: predicated region body
PF: predicated region fallthrough
CT: control target
= control target key end

     0   :  { %s1256_s0 = inlined_call_operand.hbm [shape: f32[2,32,128], index: 0, kind: input, shape index: {}]   ;;  %s1257_s1 = inlined_call_operand.hbm [shape: f32[2,128,128], index: 1, kind: input, shape index: {}]   ;;  %s1258_s2 = inlined_call_operand.hbm [shape: f32[2,32,128], index: 2, kind: input, shape index: {}]   ;;  %s1259_s3 = inlined_call_operand.hbm [shape: f32[2,32,128], index: 3, kind: output, shape index: {}]  }
   0x1   :  { %1265 = sst [smem:[#allocation18_spill]] %s1257_s1 }
   0x2   :  { %8 = vsyncpa [#allocation4], 0 }
   0x3   :  { %10 = vsyncpa [#allocation4 + $0x1], 0 }
   0x4   :  { %11 = vsyncpa [#allocation7], 0 }
   0x5   :  { %13 = vsyncpa [#allocation7 + $0x1], 0 }
   0x6   :  { %14 = vsyncpa [#allocation5], 0 }
   0x7   :  { %16 = vsyncpa [#allocation5 + $0x1], 0  ;;  %s1086_s12 = smov 0   ;;  %s1088_s13 = smov 0  }
   0x8   :  { %s1090_s14 = smov 0   ;;  %s1092_s15 = smov 0  }
   0x9   :  { %s1094_s16 = smov 0   ;;  %s1096_s17 = smov 0  }
   0xa LB: > { %1266 = sst [smem:[#allocation13_spill]] %s1048_s14  ;;  %s1117_s18 = sadd.s32 4294967295, %s1060_s17   ;;  %s1060_s17 = sphi %s1096_s17, %s22_s17   ;;  %s1056_s16 = sphi %s1094_s16, %s1286_s16   ;;  %s1052_s15 = sphi %s1092_s15, %s1285_s15   ;;  %s1048_s14 = sphi %s1090_s14, %s1281_s14   ;;  %s1044_s13 = sphi %s1088_s13, %s1284_s13   ;;  %s1040_s12 = sphi %s1086_s12, %s1283_s12  }
   0xb   : > { %1267 = sst [smem:[#allocation14_spill]] %s1060_s17  ;;  %s663_s19 = sadd.s32 4294967294, %s1060_s17  }
   0xc   : > { %s34_s20 = sadd.s32 1, %s1056_s16  ;;  %s43_s21 = sadd.s32 1, %s1048_s14 }
   0xd   : > { %p36_p0 = scmp.ge.s32.totalorder %s34_s20, 2  ;;  %p50_p1 = scmp.ne.s32.totalorder %s1048_s14, %s1044_s13 }
   0xe   : > { %p51_p2 = scmp.eq.s32.totalorder %s1060_s17, 0  ;;  %p56_p3 = scmp.ne.s32.totalorder %s1044_s13, %s1040_s12 }
   0xf   : > { %s1288_s20 = smov (%p36_p0, %s34_s20), 0  ;;  %p57_p5 = scmp.eq.s32.totalorder %s1117_s18, 0 }
  0x10   : > { %1268 = sst [smem:[#allocation15_spill]] %s1288_s20  ;;  %p1129_p4 = por %p51_p2, %p50_p1 }
  0x11   : > { %s38_s23 = ssub.s32 %s1056_s16, %s1288_s20  ;;  %p136_p6 = scmp.eq.s32.totalorder %s1117_s18, 1 }
  0x12   : > { %p41_p7 = scmp.eq.s32.totalorder %s38_s23, 0  ;;  %p1137_p8 = por %p57_p5, %p56_p3 }
  0x13   : > { %p1141_p9 = por %p136_p6, %p50_p1  ;;  %p142_p10 = scmp.eq.s32.totalorder %s663_s19, 1 }
  0x14   : > { %s1146_s26 = scalar_select %p41_p7, %s1048_s14, %s43_s21  }
  0x15   : > { %p1148_p11 = por %p142_p10, %p56_p3  ;;  %p665_p12 = scmp.ge.s32.totalorder %s1060_s17, 2 }
  0x16   : > { %1272 = sst [smem:[#allocation16_spill]] %s1146_s26  ;;  %p814_p13 = scmp.lt.s32.totalorder %s1060_s17, 2 }
  0x17   : > { %s1273_s27 = scalar_select %p1148_p11, 1, 0 }
  0x18   : > { %s1155_s28 = sand.u32 1, %s1048_s14   ;;  %p1159_p0 = pnand %p814_p13, %p1129_p4 }
  0x19   : > { %1274 = sst [smem:[#allocation17_spill]] %s1273_s27  ;;  %s186_s30 = sand.u32 1, %s1060_s17  }
  0x1a   : > { %s669_s4 = sshll.u32 %s1155_s28, 7  ;;  %s718_s5 = sshll.u32 %s1056_s16, 7 }
  0x1b   : > { %s190_s6 = scalar_lea.vmem [#allocation6], %s669_s4  ;;  %s1276_s1 = sld [smem:[#allocation18_spill]] }
  0x1c   : > { %s198_s7 = sshll.u32 %s190_s6, 4  ;;  %p675_p1 = scmp.ge.s32.totalorder %s1060_s17, 1  ;;  %s199_s7 = int_to_ptr.vmem [resolvable:$true] %s198_s7 }
  0x1d   : > { %p230_p2 = scmp.lt.s32.totalorder %s1060_s17, 3  ;;  %s187_s19 = scalar_lea.sflag [#allocation7], %s186_s30 }
  0x1e   : > { %s1062_s21 = smov 128   ;;  %s1063_s22 = smov 8  }
  0x1f   : > { %p1173_p3 = pnand %p675_p1, %p230_p2  ;;  %s666_s4 = sshll.u32 %s1155_s28, 5 }
  0x20   : > { %s717_s6 = sshll.u32 %s1056_s16, 5  ;;  %s163_s30 = scalar_lea.sflag [#allocation4], %s1155_s28 }
  0x21   : > { %s195_s10 = scalar_lea.hbm %s1276_s1, %s718_s5  ;;  %s173_s9 = scalar_lea.hbm %s1256_s0, %s717_s6 }
  0x22   : > { %s196_s11 = sshll.u32 %s195_s10, 4  ;;  %s174_s10 = sshll.u32 %s173_s9, 4  ;;  %s197_s11 = int_to_ptr.hbm [resolvable:$true] %s196_s11  ;;  %s175_s10 = int_to_ptr.hbm [resolvable:$true] %s174_s10 }
  0x23   : > { %806 = dma.hbm_to_vmem [thread:$0]  (!%p1159_p0), %s197_s11, 2048, %s199_s7, %s187_s19, %s1062_s21, %s1062_s21, %s1063_s22  }
  0x24   : > { %s166_s1 = scalar_lea.vmem [#allocation3], %s666_s4  ;;  %s219_s26 = scalar_lea.hbm %s1258_s2, %s717_s6 }
  0x25   : > { %s176_s20 = sshll.u32 %s166_s1, 4  ;;  %s220_s14 = sshll.u32 %s219_s26, 4  ;;  %s177_s20 = int_to_ptr.vmem [resolvable:$true] %s176_s20  ;;  %s221_s14 = int_to_ptr.hbm [resolvable:$true] %s220_s14 }
  0x26   : > { %803 = dma.hbm_to_vmem [thread:$0]  (!%p1159_p0), %s175_s10, 512, %s177_s20, %s163_s30, %s1062_s21, %s1062_s21, %s1063_s22  }
  0x27   : > { %s212_s17 = scalar_lea.vmem [#allocation8], %s666_s4  ;;  %234 = sbr.rel (%p1173_p3) target bundleno = 509 (0x1fd), region = 32 }
  0x28   : > { %s222_s27 = sshll.u32 %s212_s17, 4  ;;  %s1193_s1 = sand.u32 (!%p1173_p3), 1, %s1044_s13   ;;  %s223_s27 = int_to_ptr.vmem [resolvable:$true] %s222_s27 }
  0x29   : > { %809 = dma.hbm_to_vmem [thread:$0]  (!%p1159_p0), %s221_s14, 512, %s223_s27, %s187_s19, %s1062_s21, %s1062_s21, %s1063_s22  }
  0x2a   : > { %s1196_s20 = sshll.u32 (!%p1173_p3), %s1193_s1, 5  ;;  %s237_s28 = scalar_lea.sflag (!%p1173_p3), [#allocation4], %s1193_s1 }
  0x2b   : > { %s1200_s26 = scalar_lea.vmem (!%p1173_p3), [#allocation3], %s1196_s20 }
  0x2c   : > { %1027 = dma.done.wait (%p1137_p8), %s237_s28, 512  }
  0x2d   : > { %1029 = vsyncadd (%p1137_p8), %s237_s28, 4294966784  ;;  %s246_s14 = sand.u32 1, %s1117_s18   ;;  %s677_s17 = sshll.u32 %s1193_s1, 7 }
  0x2e   : > { %s247_s27 = scalar_lea.sflag [#allocation7], %s246_s14  ;;  %s250_s29 = scalar_lea.vmem [#allocation6], %s677_s17 }
  0x2f   : > { %1031 = dma.done.wait (%p1137_p8), %s247_s27, 2560  }
  0x30   : > { %1033 = vsyncadd (%p1137_p8), %s247_s27, 4294964736  ;;  %v315_v0 = vld [vmem:[%s250_s29 + $0x70] sm:$0xff]  ;;  %v316_v1 = vld [vmem:[%s250_s29 + $0x78] sm:$0xff]  ;;  %s260_s18 = scalar_lea.vmem [#allocation8], %s1196_s20  ;;  %s293_s24 = scalar_lea.vmem [#allocation9], %s1196_s20 }
  0x31   : > { %v313_v2 = vld [vmem:[%s250_s29 + $0x60] sm:$0xff]  ;;  %v767_v3 = vpack.c.bf16 %v316_v1, %v315_v0  ;;  %v314_v4 = vld [vmem:[%s250_s29 + $0x68] sm:$0xff]  ;;  %v311_v5 = vld [vmem:[%s250_s29 + $0x50] sm:$0xff]  ;;  %s728_s19 = sshll.u32 %s1052_s15, 5  ;;  %s526_s4 = sshll.u32 %s293_s24, 4  ;;  %s527_s4 = int_to_ptr.vmem [resolvable:$true] %s526_s4 }
  0x32   : > { %v312_v6 = vld [vmem:[%s250_s29 + $0x58] sm:$0xff]  ;;  %v762_v7 = vpack.c.bf16 %v314_v4, %v313_v2  ;;  %v309_v9 = vld [vmem:[%s250_s29 + $0x40] sm:$0xff]  ;;  %v310_v10 = vld [vmem:[%s250_s29 + $0x48] sm:$0xff]  ;;  %s525_s23 = scalar_lea.hbm %s1259_s3, %s728_s19  ;;  %s512_s5 = scalar_lea.sflag [#allocation5], %s1193_s1 }
  0x33   : > { %v757_v8 = vpack.c.bf16 %v312_v6, %v311_v5  ;;  %v307_v11 = vld [vmem:[%s250_s29 + $0x30] sm:$0xff]  ;;  %775 = vst [vmem:[#allocation2 + $0x38] sm:$0xff] %v767_v3   ;;  %v752_v12 = vpack.c.bf16 %v310_v10, %v309_v9  ;;  %v308_v13 = vld [vmem:[%s250_s29 + $0x38] sm:$0xff]  ;;  %v305_v14 = vld [vmem:[%s250_s29 + $0x20] sm:$0xff]  ;;  %s528_s6 = sshll.u32 %s525_s23, 4  ;;  %s994_s30 = scalar_lea.hbm %s1259_s3, 64  ;;  %s529_s6 = int_to_ptr.hbm [resolvable:$true] %s528_s6 }
  0x34   : > { %v306_v15 = vld [vmem:[%s250_s29 + $0x28] sm:$0xff]  ;;  %774 = vst [vmem:[#allocation2 + $0x28] sm:$0xff] %v762_v7   ;;  %v747_v16 = vpack.c.bf16 %v308_v13, %v307_v11  ;;  %v303_v18 = vld [vmem:[%s250_s29 + $0x10] sm:$0xff]  ;;  %v304_v19 = vld [vmem:[%s250_s29 + $0x18] sm:$0xff]  ;;  %s988_s15 = sshra.s32 %s529_s6, 4  ;;  %s989_s15 = int_to_ptr.hbm [resolvable:$true] %s988_s15 }
  0x35   : > { %v742_v17 = vpack.c.bf16 %v306_v15, %v305_v14  ;;  %v301_v20 = vld [vmem:[%s250_s29] sm:$0xff]  ;;  %773 = vst [vmem:[#allocation2 + $0x20] sm:$0xff] %v757_v8   ;;  %v737_v21 = vpack.c.bf16 %v304_v19, %v303_v18  ;;  %v302_v22 = vld [vmem:[%s250_s29 + $0x8] sm:$0xff]  ;;  %v367_v34 = vld [vmem:[%s1200_s26 + $0x10] sm:$0xff]  ;;  %s990_s8 = scalar_lea.hbm %s989_s15, 32  ;;  %p995_p7 = scmp.lt.s32.totalorder %s989_s15, %s1259_s3 }
  0x36   : > { %772 = vst [vmem:[#allocation2 + $0x8] sm:$0xff] %v752_v12   ;;  %v732_v23 = vpack.c.bf16 %v302_v22, %v301_v20  ;;  %v365_v31 = vld [vmem:[%s1200_s26] sm:$0xff]  ;;  %v366_v32 = vld [vmem:[%s1200_s26 + $0x8] sm:$0xff]  ;;  %v368_v35 = vld [vmem:[%s1200_s26 + $0x18] sm:$0xff]  ;;  %p991_p4 = scmp.ne.s32.totalorder %s989_s15, %s990_s8  ;;  %p996_p8 = scmp.lt.s32.totalorder %s994_s30, %s990_s8 }
  0x37   : > { %771 = vst [vmem:[#allocation2 + $0x10] sm:$0xff] %v747_v16   ;;  %v369_v36 = vpack.c.bf16 %v366_v32, %v365_v31  ;;  %v370_v37 = vpack.c.bf16 %v368_v35, %v367_v34  ;;  %v442_v39 = vld [vmem:[%s260_s18] sm:$0xff]  ;;  %v444_v43 = vld [vmem:[%s260_s18 + $0x10] sm:$0xff]  ;;  %v443_v46 = vld [vmem:[%s260_s18 + $0x8] sm:$0xff] }
  0x38   : > { %770 = vst [vmem:[#allocation2 + $0x18] sm:$0xff] %v742_v17   ;;  %v445_v51 = vld [vmem:[%s260_s18 + $0x18] sm:$0xff]  ;;  %p992_p5 = pnand %p991_p4, %p1141_p9  ;;  %p997_p10 = por %p996_p8, %p995_p7 }
  0x39   : > { %769 = vst [vmem:[#allocation2] sm:$0xff] %v737_v21  }
  0x3a   : > { %v727_v24 = vld [vmem:[#allocation2 + $0x38] sm:$0xff]  ;;  %733 = vst [vmem:[#allocation2 + $0x30] sm:$0xff] %v732_v23   ;;  %p993_p6 = pneg %p992_p5 }
  0x3b   : > { %419 = vmatpush.bf16.msra.mxu0 %v727_v24  ;;  %776 = vmatpush.bf16.msra.mxu2 %v727_v24  ;;  %v726_v25 = vld [vmem:[#allocation2 + $0x28] sm:$0xff] }
  0x3c   : > { %480 = vmatpush.bf16.msra.mxu1 %v727_v24  ;;  %784 = vmatpush.bf16.msra.mxu3 %v727_v24  ;;  %v725_v26 = vld [vmem:[#allocation2 + $0x20] sm:$0xff]  ;;  %p998_p13 = pnand %p997_p10, %p993_p6 }
  0x3d   : > { %v724_v27 = vld [vmem:[#allocation2 + $0x8] sm:$0xff] }
  0x3e   : > { %v723_v28 = vld [vmem:[#allocation2 + $0x10] sm:$0xff] }
  0x3f   : > { %420 = vmatpush.bf16.msra.mxu0 %v726_v25  ;;  %777 = vmatpush.bf16.msra.mxu2 %v726_v25  ;;  %v722_v29 = vld [vmem:[#allocation2 + $0x18] sm:$0xff] }
  0x40   : > { %481 = vmatpush.bf16.msra.mxu1 %v726_v25  ;;  %785 = vmatpush.bf16.msra.mxu3 %v726_v25  ;;  %v721_v30 = vld [vmem:[#allocation2] sm:$0xff] }
  0x41   : > { %v720_v33 = vld [vmem:[#allocation2 + $0x30] sm:$0xff] }
  0x43   : > { %421 = vmatpush.bf16.msra.mxu0 %v725_v26  ;;  %778 = vmatpush.bf16.msra.mxu2 %v725_v26 }
  0x44   : > { %482 = vmatpush.bf16.msra.mxu1 %v725_v26  ;;  %786 = vmatpush.bf16.msra.mxu3 %v725_v26 }
  0x47   : > { %422 = vmatpush.bf16.msra.mxu0 %v724_v27  ;;  %779 = vmatpush.bf16.msra.mxu2 %v724_v27 }
  0x48   : > { %483 = vmatpush.bf16.msra.mxu1 %v724_v27  ;;  %787 = vmatpush.bf16.msra.mxu3 %v724_v27 }
  0x4b   : > { %423 = vmatpush.bf16.msra.mxu0 %v723_v28  ;;  %780 = vmatpush.bf16.msra.mxu2 %v723_v28 }
  0x4c   : > { %484 = vmatpush.bf16.msra.mxu1 %v723_v28  ;;  %788 = vmatpush.bf16.msra.mxu3 %v723_v28 }
  0x4f   : > { %424 = vmatpush.bf16.msra.mxu0 %v722_v29  ;;  %781 = vmatpush.bf16.msra.mxu2 %v722_v29 }
  0x50   : > { %485 = vmatpush.bf16.msra.mxu1 %v722_v29  ;;  %789 = vmatpush.bf16.msra.mxu3 %v722_v29 }
  0x53   : > { %425 = vmatpush.bf16.msra.mxu0 %v721_v30  ;;  %782 = vmatpush.bf16.msra.mxu2 %v721_v30 }
  0x54   : > { %486 = vmatpush.bf16.msra.mxu1 %v721_v30  ;;  %790 = vmatpush.bf16.msra.mxu3 %v721_v30 }
  0x57   : > { %426 = vmatpush.bf16.msra.mxu0 %v720_v33  ;;  %783 = vmatpush.bf16.msra.mxu2 %v720_v33 }
  0x58   : > { %487 = vmatpush.bf16.msra.mxu1 %v720_v33  ;;  %791 = vmatpush.bf16.msra.mxu3 %v720_v33 }
  0x5a   : > { %427 = vmatmul.bf16.vlgmr.msra.gmra.mxu0 %v369_v36  ;;  %432 = vmatmul.bf16.vlgmr.msra.gmra.mxu2 %v370_v37 }
  0xd7   : > { %v428_v38 = vpop.f32.mrf.mxu0 }
  0xd8   : > { %v438_v40 = vmul.f32 0.088388346, %v428_v38 }
  0xda   : > { %v446_v41 = vadd.f32 %v442_v39, %v438_v40 }
  0xdc   : > { %450 = vmax.xlane.f32.xlu1 %v446_v41 }
  0xdd   : > { %v433_v42 = vpop.f32.mrf.mxu2 }
  0xde   : > { %v440_v44 = vmul.f32 0.088388346, %v433_v42 }
  0xdf   : > { %v430_v45 = vpop.f32.mrf.mxu0 }
  0xe0   : > { %v439_v47 = vmul.f32 0.088388346, %v430_v45  ;;  %v448_v48 = vadd.f32 %v444_v43, %v440_v44 }
  0xe2   : > { %454 = vmax.xlane.f32.xlu0 %v448_v48  ;;  %v447_v49 = vadd.f32 %v443_v46, %v439_v47 }
  0xe4   : > { %452 = vmax.xlane.f32.xlu1 %v447_v49 }
  0xe5   : > { %v435_v50 = vpop.f32.mrf.mxu2 }
  0xe6   : > { %v441_v52 = vmul.f32 0.088388346, %v435_v50 }
  0xe8   : > { %v449_v53 = vadd.f32 %v445_v51, %v441_v52 }
  0xea   : > { %456 = vmax.xlane.f32.xlu0 %v449_v53 }
 0x14f   : > { %v451_v54 = vpop.xlane.xlu1 %450 }
 0x150   : > { %v458_v55 = vsub.f32 %v446_v41, %v451_v54 }
 0x152   : > { %v462_v56 = vmul.f32 1.442695, %v458_v55 }
 0x154   : > { %868 = vpow2.f32 %v462_v56 }
 0x155   : > { %v455_v57 = vpop.xlane.xlu0 %454 }
 0x156   : > { %v460_v58 = vsub.f32 %v448_v48, %v455_v57 }
 0x157   : > { %v453_v59 = vpop.xlane.xlu1 %452 }
 0x158   : > { %v466_v60 = vmul.f32 1.442695, %v460_v58  ;;  %v459_v61 = vsub.f32 %v447_v49, %v453_v59 }
 0x15a   : > { %v869_v62 = vpop.eup %868  ;;  %870 = vpow2.f32 %v466_v60  ;;  %v464_v63 = vmul.f32 1.442695, %v459_v61 }
 0x15b   : > { %470 = vadd.xlane.f32.xlu2 %v869_v62 }
 0x15c   : > { %872 = vpow2.f32 %v464_v63 }
 0x15d   : > { %v457_v0 = vpop.xlane.xlu0 %456 }
 0x15e   : > { %v461_v1 = vsub.f32 %v449_v53, %v457_v0 }
 0x160   : > { %v871_v2 = vpop.eup %870  ;;  %v468_v3 = vmul.f32 1.442695, %v461_v1 }
 0x161   : > { %474 = vadd.xlane.f32.xlu0 %v871_v2 }
 0x162   : > { %v873_v4 = vpop.eup %872  ;;  %874 = vpow2.f32 %v468_v3 }
 0x163   : > { %472 = vadd.xlane.f32.xlu2 %v873_v4  ;;  %v478_v5 = vpack.c.bf16 %v873_v4, %v869_v62 }
 0x165   : > { %488 = vmatmul.bf16.vlgmr.msra.gmra.mxu1 %v478_v5 }
 0x168   : > { %v875_v6 = vpop.eup %874 }
 0x169   : > { %476 = vadd.xlane.f32.xlu1 %v875_v6  ;;  %v479_v7 = vpack.c.bf16 %v875_v6, %v871_v2 }
 0x16b   : > { %493 = vmatmul.bf16.vlgmr.msra.gmra.mxu3 %v479_v7 }
 0x1ce   : > { %v471_v8 = vpop.xlane.xlu2 %470 }
 0x1cf   : > { %876 = vrcp.f32 %v471_v8 }
 0x1d4   : > { %v475_v13 = vpop.xlane.xlu0 %474 }
 0x1d5   : > { %v877_v10 = vpop.eup %876 }
 0x1d6   : > { %v473_v9 = vpop.xlane.xlu2 %472 }
 0x1d7   : > { %878 = vrcp.f32 %v473_v9 }
 0x1d8   : > { %880 = vrcp.f32 %v475_v13 }
 0x1dc   : > { %v477_v17 = vpop.xlane.xlu1 %476 }
 0x1dd   : > { %v879_v14 = vpop.eup %878  ;;  %882 = vrcp.f32 %v477_v17 }
 0x1de   : > { %v881_v18 = vpop.eup %880 }
 0x1e2   : > { %v489_v11 = vpop.f32.mrf.mxu1 }
 0x1e3   : > { %v503_v12 = vmul.f32 %v877_v10, %v489_v11  ;;  %v883_v21 = vpop.eup %882 }
 0x1e5   : > { %507 = vst [vmem:[%s293_s24] sm:$0xff] %v503_v12 }
 0x1ea   : > { %v491_v15 = vpop.f32.mrf.mxu1 }
 0x1eb   : > { %v504_v16 = vmul.f32 %v879_v14, %v491_v15 }
 0x1ed   : > { %508 = vst [vmem:[%s293_s24 + $0x8] sm:$0xff] %v504_v16 }
 0x1ee   : > { %v494_v19 = vpop.f32.mrf.mxu3 }
 0x1ef   : > { %v505_v20 = vmul.f32 %v881_v18, %v494_v19 }
 0x1f1   : > { %509 = vst [vmem:[%s293_s24 + $0x10] sm:$0xff] %v505_v20 }
 0x1f6   : > { %v496_v22 = vpop.f32.mrf.mxu3 }
 0x1f7   : > { %v506_v23 = vmul.f32 %v883_v21, %v496_v22 }
 0x1f9   : > { %510 = vst [vmem:[%s293_s24 + $0x18] sm:$0xff] %v506_v23 }
 0x1fa   : > { %1001 = shalt.err (!%p998_p13)
}
 0x1fb   : > { %s1064_s1 = smov 128   ;;  %s1065_s20 = smov 8  }
 0x1fc   : > { %798 = dma.vmem_to_hbm [thread:$0]  (%p1141_p9), %s527_s4, 512, %s529_s6, %s512_s5, %s1064_s1, %s1064_s1, %s1065_s20  }
 0x1fd PF: > { %s1279_s26 = sld [smem:[#allocation14_spill]]  ;;  %s543_s14 = sand.u32 1, %s1040_s12  }
 0x1fe   : > { %p811_p0 = pnand %p665_p12, %p1148_p11  ;;  %s544_s17 = scalar_lea.sflag [#allocation5], %s543_s14 }
 0x200   : > { %p812_p1 = pneg %p811_p0 }
 0x202   : > { %1035 = dma.done.wait (%p812_p1), %s544_s17, 512  }
 0x203   : > { %1037 = vsyncadd (%p812_p1), %s544_s17, 4294966784  ;;  %s22_s17 = sadd.s32 1, %s1279_s26   ;;  %s1280_s27 = sld [smem:[#allocation13_spill]] }
 0x204   : > { %p19_p2 = scmp.ge.s32.totalorder %s22_s17, 4   ;;  %s1281_s14 = sld [smem:[#allocation16_spill]] }
 0x205   : > { %s1282_s25 = sld [smem:[#allocation15_spill]]  ;;  %s1283_s12 = smov %s1044_s13 }
 0x206   : > { %s1285_s15 = smov %s1056_s16 }
 0x207   :  { %21 = sbr.rel (!%p19_p2) target bundleno = 10 (0xa), region = 105 }
 0x209   : > { %s1284_s13 = smov %s1280_s27 }
 0x20b   : > { %s1286_s16 = smov %s1282_s25 }
 0x20c   :  { %550 = vsyncpa [#allocation4], 1 }
 0x20d   :  { %552 = vsyncpa [#allocation4 + $0x1], 1 }
 0x20e   :  { %553 = vsyncpa [#allocation7], 1 }
 0x20f   :  { %555 = vsyncpa [#allocation7 + $0x1], 1 }
 0x210   :  { %556 = vsyncpa [#allocation5], 1 }
 0x211   :  { %558 = vsyncpa [#allocation5 + $0x1], 1 }

</bundles_post_ra>
